<compile_context>
chip_gen: v7x
topology: tpu7x:2x2x1
jax: 0.10.0
libtpu: 0.0.40
codegen_flags: <defaults>
</compile_context>

<pallas_src>
import functools

import jax
import jax.numpy as jnp
from jax.experimental import pallas as pl
from jax.experimental.pallas import tpu as pltpu

_LANE = 128


def _round_up(v, m):
    return (v + m - 1) // m * m


def _pad2d(a, rows, cols, dtype):
    out = jnp.zeros((rows, cols), dtype)
    return out.at[: a.shape[0], : a.shape[1]].set(a.astype(dtype))


# ---------------------------------------------------------------------------
# Fused forward kernel: all operands live in VMEM for the whole forward pass.
# bf16 on the MXU (f32 accumulate), f32 for every elementwise op.
# ---------------------------------------------------------------------------
def adagnn_fused_kernel(l_ref, x_ref, phi0_ref, phir_ref, w1_ref, b1_ref,
                        wout_ref, bout_ref, o_ref, *, num_layer):
    l_bf = l_ref[...]                              # bf16 (Np, Np), read once, reused

    # AdaConv_0 on the raw (padded) features:  x = x - (L @ x) * phi_0
    x = x_ref[...]                                 # f32 (Np, Fp)
    lx = jnp.dot(l_bf, x.astype(jnp.bfloat16),
                 preferred_element_type=jnp.float32)
    x = x - lx * phi0_ref[...]                     # (1, Fp) sublane broadcast, f32

    # Encoder: relu(x @ W1 + b1)
    x = jnp.dot(x.astype(jnp.bfloat16), w1_ref[...],
                preferred_element_type=jnp.float32) + b1_ref[...]
    x = jnp.maximum(x, 0.0)

    # AdaConv_1 .. AdaConv_{num_layer-1}; x stays on-chip the whole time.
    for l in range(1, num_layer):                  # static trip count (num_layer small)
        lx = jnp.dot(l_bf, x.astype(jnp.bfloat16),
                     preferred_element_type=jnp.float32)
        x = x - lx * phir_ref[l - 1]               # (1, Hp) broadcast, f32

    # Decoder: x @ Wout + bout  (lane-dense padded output -> unmasked stores)
    o_ref[...] = (jnp.dot(x.astype(jnp.bfloat16), wout_ref[...],
                          preferred_element_type=jnp.float32) + bout_ref[...])


# ---------------------------------------------------------------------------
# Setup: pad once, build the pallas_call once, return a jitted forward(x).
# ---------------------------------------------------------------------------
def make_adagnn_forward(params, L):
    N = L.shape[0]
    F, H = params["w1"].shape
    O = params["w_out"].shape[1]
    num_layer = len(params["phi"])

    Np = _round_up(N, _LANE)
    Fp = _round_up(F, _LANE)
    Hp = _round_up(H, _LANE)
    Op = _round_up(O, _LANE)

    # ---- one-time host-side padding (exact: only adds 0.0 contributions) ----
    L_p = _pad2d(L, Np, Np, jnp.bfloat16)
    phi0_p = _pad2d(params["phi"][0].reshape(1, F), 1, Fp, jnp.float32)
    n_rest = max(num_layer - 1, 1)
    phir_p = jnp.zeros((n_rest, 1, Hp), jnp.float32)
    for l in range(1, num_layer):
        phir_p = phir_p.at[l - 1, 0, :H].set(params["phi"][l])
    w1_p = _pad2d(params["w1"], Fp, Hp, jnp.bfloat16)
    b1_p = _pad2d(params["b1"].reshape(1, H), 1, Hp, jnp.float32)
    wout_p = _pad2d(params["w_out"], Hp, Op, jnp.bfloat16)
    bout_p = _pad2d(params["b_out"].reshape(1, O), 1, Op, jnp.float32)

    # ---- VMEM footprint check + compiler hints ----
    operand_bytes = (Np * Np * 2           # L (bf16)
                     + Np * Fp * 4         # x (f32)
                     + Fp * 4 + n_rest * Hp * 4
                     + Fp * Hp * 2 + Hp * 4
                     + Hp * Op * 2 + Op * 4
                     + Np * Op * 4)        # output
    work_bytes = Np * max(Fp, Hp) * (4 + 4 + 2)    # x (f32) + lx (f32) + bf16 cast
    footprint = operand_bytes + work_bytes

    try:
        vmem_cap = int(pltpu.get_tpu_info().vmem_capacity_bytes)
    except Exception:
        vmem_cap = 64 * 1024 * 1024        # v7x worst case
    if footprint > int(0.75 * vmem_cap):
        # TODO(synk): row/K-tiled AdaConv pipeline fallback for L that exceeds VMEM.
        raise NotImplementedError(
            f"fused AdaGNN footprint {footprint} B exceeds VMEM budget "
            f"({vmem_cap} B); tiled fallback not implemented")

    vmem_limit = int(min(vmem_cap, max(32 * 1024 * 1024, 2 * footprint)))
    flops = 2 * (Np * Np * Fp                        # AdaConv_0
                 + Np * Fp * Hp                      # encoder
                 + (num_layer - 1) * Np * Np * Hp    # AdaConv_1..
                 + Np * Hp * Op)                     # decoder
    cost = pl.CostEstimate(flops=flops, transcendentals=0,
                           bytes_accessed=operand_bytes)

    call = pl.pallas_call(
        functools.partial(adagnn_fused_kernel, num_layer=num_layer),
        out_shape=jax.ShapeDtypeStruct((Np, Op), jnp.float32),
        in_specs=[pl.BlockSpec(memory_space=pltpu.MemorySpace.VMEM)] * 8,
        out_specs=pl.BlockSpec(memory_space=pltpu.MemorySpace.VMEM),
        compiler_params=pltpu.CompilerParams(vmem_limit_bytes=vmem_limit),
        cost_estimate=cost,
    )

    def forward(x):
        # Only the (N, F) feature matrix is padded per call; everything else cached.
        x_p = jnp.zeros((Np, Fp), jnp.float32).at[:N, :F].set(x)
        out_p = call(L_p, x_p, phi0_p, phir_p, w1_p, b1_p, wout_p, bout_p)
        return out_p[:N, :O]

    return jax.jit(forward)


# ---------------------------------------------------------------------------
# Pure-JAX references (unpadded) for correctness check.
# ---------------------------------------------------------------------------
def adagnn_reference_f32(params, L, x):
    x = x - (L @ x) * params["phi"][0][None, :]
    x = jnp.maximum(x @ params["w1"] + params["b1"][None, :], 0.0)
    for phi in params["phi"][1:]:
        x = x - (L @ x) * phi[None, :]
    x = x @ params["w_out"] + params["b_out"][None, :]
    return x


def adagnn_reference_bf16(params, L, x):
    # Matched-precision reference: bf16 matmul inputs, f32 accumulate/elementwise,
    # same as the kernel.
    bf = jnp.bfloat16
    lx = jnp.dot(L.astype(bf), x.astype(bf), preferred_element_type=jnp.float32)
    x = x - lx * params["phi"][0][None, :]
    x = jnp.maximum(
        jnp.dot(x.astype(bf), params["w1"].astype(bf),
                preferred_element_type=jnp.float32) + params["b1"][None, :], 0.0)
    for phi in params["phi"][1:]:
        lx = jnp.dot(L.astype(bf), x.astype(bf),
                     preferred_element_type=jnp.float32)
        x = x - lx * phi[None, :]
    x = (jnp.dot(x.astype(bf), params["w_out"].astype(bf),
                 preferred_element_type=jnp.float32) + params["b_out"][None, :])
    return x


# ---------------------------------------------------------------------------
# Deterministic parameter / input construction
# ---------------------------------------------------------------------------
def make_params(key, num_features, hidden_dim, num_classes, num_layer):
    ks = jax.random.split(key, 4 + num_layer)
    # PyTorch nn.Linear default init: U(-1/sqrt(fan_in), 1/sqrt(fan_in))
    lim1 = 1.0 / jnp.sqrt(num_features)
    limo = 1.0 / jnp.sqrt(hidden_dim)
    params = {
        "w1": jax.random.uniform(ks[0], (num_features, hidden_dim),
                                 jnp.float32, -lim1, lim1),
        "b1": jax.random.uniform(ks[1], (hidden_dim,), jnp.float32, -lim1, lim1),
        "w_out": jax.random.uniform(ks[2], (hidden_dim, num_classes),
                                    jnp.float32, -limo, limo),
        "b_out": jax.random.uniform(ks[3], (num_classes,), jnp.float32,
                                    -limo, limo),
        "phi": [],
    }
    dims = [num_features] + [hidden_dim] * (num_layer - 1)
    for i, d in enumerate(dims):
        params["phi"].append(
            0.1 * jax.random.normal(ks[4 + i], (d,), jnp.float32))
    return params


def make_laplacian(key, n):
    # symmetric normalized Laplacian  L = I - D^-1/2 (A + I) D^-1/2
    a = (jax.random.uniform(key, (n, n)) < 0.1).astype(jnp.float32)
    a = jnp.maximum(a, a.T)
    a = a + jnp.eye(n, dtype=jnp.float32)          # self loops
    d = jnp.sum(a, axis=1)
    d_inv_sqrt = 1.0 / jnp.sqrt(d)
    a_norm = a * d_inv_sqrt[:, None] * d_inv_sqrt[None, :]
    return jnp.eye(n, dtype=jnp.float32) - a_norm


if __name__ == "__main__":
    N = 64            # number of graph nodes
    num_features = 16
    hidden_dim = 32
    num_classes = 8
    num_layer = 3

    key = jax.random.PRNGKey(0)
    k_lap, k_x, k_par = jax.random.split(key, 3)

    L = make_laplacian(k_lap, N)
    x = jax.random.normal(k_x, (N, num_features), jnp.float32)
    params = make_params(k_par, num_features, hidden_dim, num_classes, num_layer)

    forward = make_adagnn_forward(params, L)
    out = jax.block_until_ready(forward(x))

    assert out.shape == (N, num_classes)
    # Tight check against a matched-precision (bf16 MXU inputs, f32 acc) reference.
    ref_bf16 = adagnn_reference_bf16(params, L, x)
    assert jnp.allclose(out, ref_bf16, atol=1e-3, rtol=1e-3), \
        "mismatch vs matched-precision reference"
    # Loose check against the full-f32 reference (bf16 rounding of MXU inputs).
    ref_f32 = adagnn_reference_f32(params, L, x)
    assert jnp.allclose(out, ref_f32, atol=5e-2, rtol=5e-2), \
        "mismatch vs f32 reference"

    print("KERNEL_OK")
</pallas_src>

<mosaic_0001>
module attributes {stable_mosaic.version = 11 : i64} {
  func.func @adagnn_fused_kernel(%arg0: memref<128x128xbf16, #tpu.memory_space<vmem>>, %arg1: memref<128x128xf32, #tpu.memory_space<vmem>>, %arg2: memref<1x128xf32, #tpu.memory_space<vmem>>, %arg3: memref<2x1x128xf32, #tpu.memory_space<vmem>>, %arg4: memref<128x128xbf16, #tpu.memory_space<vmem>>, %arg5: memref<1x128xf32, #tpu.memory_space<vmem>>, %arg6: memref<128x128xbf16, #tpu.memory_space<vmem>>, %arg7: memref<1x128xf32, #tpu.memory_space<vmem>>, %arg8: memref<128x128xf32, #tpu.memory_space<vmem>>) attributes {dimension_semantics = [], scalar_prefetch = 0 : i64, scratch_operands = 0 : i64, tpu.core_type = #tpu.core_type<tc>} {
    %c0 = arith.constant 0 : index
    %c0_0 = arith.constant 0 : index
    %0 = vector.load %arg0[%c0, %c0_0] : memref<128x128xbf16, #tpu.memory_space<vmem>>, vector<128x128xbf16>
    %c0_1 = arith.constant 0 : index
    %c0_2 = arith.constant 0 : index
    %1 = vector.load %arg1[%c0_1, %c0_2] : memref<128x128xf32, #tpu.memory_space<vmem>>, vector<128x128xf32>
    %2 = arith.truncf %1 : vector<128x128xf32> to vector<128x128xbf16>
    %cst = arith.constant dense<0.000000e+00> : vector<128x128xf32>
    %3 = tpu.matmul %0, %2, %cst {dimension_numbers = #tpu.dot_dimension_numbers<[1], [0], [0], [1], [0, 0, 1, 1], [], []>} : vector<128x128xbf16>, vector<128x128xbf16>, vector<128x128xf32> -> vector<128x128xf32>
    %c0_3 = arith.constant 0 : index
    %c0_4 = arith.constant 0 : index
    %4 = vector.load %arg2[%c0_3, %c0_4] : memref<1x128xf32, #tpu.memory_space<vmem>>, vector<1x128xf32>
    %5 = vector.broadcast %4 : vector<1x128xf32> to vector<128x128xf32>
    %6 = arith.mulf %3, %5 : vector<128x128xf32>
    %7 = arith.subf %1, %6 : vector<128x128xf32>
    %8 = arith.truncf %7 : vector<128x128xf32> to vector<128x128xbf16>
    %c0_5 = arith.constant 0 : index
    %c0_6 = arith.constant 0 : index
    %9 = vector.load %arg4[%c0_5, %c0_6] : memref<128x128xbf16, #tpu.memory_space<vmem>>, vector<128x128xbf16>
    %cst_7 = arith.constant dense<0.000000e+00> : vector<128x128xf32>
    %10 = tpu.matmul %8, %9, %cst_7 {dimension_numbers = #tpu.dot_dimension_numbers<[1], [0], [0], [1], [0, 0, 1, 1], [], []>} : vector<128x128xbf16>, vector<128x128xbf16>, vector<128x128xf32> -> vector<128x128xf32>
    %c0_8 = arith.constant 0 : index
    %c0_9 = arith.constant 0 : index
    %11 = vector.load %arg5[%c0_8, %c0_9] : memref<1x128xf32, #tpu.memory_space<vmem>>, vector<1x128xf32>
    %12 = vector.broadcast %11 : vector<1x128xf32> to vector<128x128xf32>
    %13 = arith.addf %10, %12 : vector<128x128xf32>
    %cst_10 = arith.constant 0.000000e+00 : f32
    %14 = vector.broadcast %cst_10 : f32 to vector<128x128xf32>
    %15 = arith.maximumf %13, %14 : vector<128x128xf32>
    %16 = arith.truncf %15 : vector<128x128xf32> to vector<128x128xbf16>
    %cst_11 = arith.constant dense<0.000000e+00> : vector<128x128xf32>
    %17 = tpu.matmul %0, %16, %cst_11 {dimension_numbers = #tpu.dot_dimension_numbers<[1], [0], [0], [1], [0, 0, 1, 1], [], []>} : vector<128x128xbf16>, vector<128x128xbf16>, vector<128x128xf32> -> vector<128x128xf32>
    %c0_12 = arith.constant 0 : index
    %c0_13 = arith.constant 0 : index
    %c0_14 = arith.constant 0 : index
    %18 = vector.load %arg3[%c0_12, %c0_13, %c0_14] : memref<2x1x128xf32, #tpu.memory_space<vmem>>, vector<1x1x128xf32>
    %19 = vector.shape_cast %18 : vector<1x1x128xf32> to vector<1x128xf32>
    %20 = vector.broadcast %19 : vector<1x128xf32> to vector<128x128xf32>
    %21 = arith.mulf %17, %20 : vector<128x128xf32>
    %22 = arith.subf %15, %21 : vector<128x128xf32>
    %23 = arith.truncf %22 : vector<128x128xf32> to vector<128x128xbf16>
    %cst_15 = arith.constant dense<0.000000e+00> : vector<128x128xf32>
    %24 = tpu.matmul %0, %23, %cst_15 {dimension_numbers = #tpu.dot_dimension_numbers<[1], [0], [0], [1], [0, 0, 1, 1], [], []>} : vector<128x128xbf16>, vector<128x128xbf16>, vector<128x128xf32> -> vector<128x128xf32>
    %c1 = arith.constant 1 : index
    %c0_16 = arith.constant 0 : index
    %c0_17 = arith.constant 0 : index
    %25 = vector.load %arg3[%c1, %c0_16, %c0_17] : memref<2x1x128xf32, #tpu.memory_space<vmem>>, vector<1x1x128xf32>
    %26 = vector.shape_cast %25 : vector<1x1x128xf32> to vector<1x128xf32>
    %27 = vector.broadcast %26 : vector<1x128xf32> to vector<128x128xf32>
    %28 = arith.mulf %24, %27 : vector<128x128xf32>
    %29 = arith.subf %22, %28 : vector<128x128xf32>
    %30 = arith.truncf %29 : vector<128x128xf32> to vector<128x128xbf16>
    %c0_18 = arith.constant 0 : index
    %c0_19 = arith.constant 0 : index
    %31 = vector.load %arg6[%c0_18, %c0_19] : memref<128x128xbf16, #tpu.memory_space<vmem>>, vector<128x128xbf16>
    %cst_20 = arith.constant dense<0.000000e+00> : vector<128x128xf32>
    %32 = tpu.matmul %30, %31, %cst_20 {dimension_numbers = #tpu.dot_dimension_numbers<[1], [0], [0], [1], [0, 0, 1, 1], [], []>} : vector<128x128xbf16>, vector<128x128xbf16>, vector<128x128xf32> -> vector<128x128xf32>
    %c0_21 = arith.constant 0 : index
    %c0_22 = arith.constant 0 : index
    %33 = vector.load %arg7[%c0_21, %c0_22] : memref<1x128xf32, #tpu.memory_space<vmem>>, vector<1x128xf32>
    %34 = vector.broadcast %33 : vector<1x128xf32> to vector<128x128xf32>
    %35 = arith.addf %32, %34 : vector<128x128xf32>
    %c0_23 = arith.constant 0 : index
    %c0_24 = arith.constant 0 : index
    %36 = vector.load %arg8[%c0_23, %c0_24] : memref<128x128xf32, #tpu.memory_space<vmem>>, vector<128x128xf32>
    tpu.vector_store %arg8[%c0_23, %c0_24], %35 {strides = array<i32>} : memref<128x128xf32, #tpu.memory_space<vmem>>, vector<128x128xf32>,
    return
  }
}

</mosaic_0001>

<bundles_post_ra>
// kernel: forward.1
= control target key start
LH: loop header
LB: loop body
LE: loop exit
PB: predicated region body
PF: predicated region fallthrough
CT: control target
= control target key end

     0   :  { %s1785_s1 = inlined_call_operand.vmem [shape: f32[128,128], index: 1, kind: input, shape index: {}]   ;;  %s1786_s0 = inlined_call_operand.vmem [shape: bf16[128,128], index: 0, kind: input, shape index: {}]   ;;  %s1787_s4 = inlined_call_operand.vmem [shape: bf16[128,128], index: 4, kind: input, shape index: {}]   ;;  %s1788_s2 = inlined_call_operand.vmem [shape: f32[1,128], index: 2, kind: input, shape index: {}]   ;;  %s1789_s5 = inlined_call_operand.vmem [shape: f32[1,128], index: 5, kind: input, shape index: {}]   ;;  %s1790_s6 = inlined_call_operand.vmem [shape: bf16[128,128], index: 6, kind: input, shape index: {}]   ;;  %s1791_s3 = inlined_call_operand.vmem [shape: f32[2,1,128], index: 3, kind: input, shape index: {}]   ;;  %s1792_s7 = inlined_call_operand.vmem [shape: f32[1,128], index: 7, kind: input, shape index: {}]   ;;  %s1793_s8 = inlined_call_operand.vmem [shape: f32[128,128], index: 8, kind: output, shape index: {}]  }
   0x1   :  { %v1289_v0 = vld [vmem:[%s1785_s1] sm:$0xff]  ;;  %v1294_v1 = vld [vmem:[%s1785_s1 + $0x8] sm:$0xff]  ;;  %v1299_v2 = vld [vmem:[%s1785_s1 + $0x10] sm:$0xff] }
   0x2   :  { %v62_v3 = vpack.c.bf16 %v1294_v1, %v1289_v0  ;;  %v1306_v4 = vld [vmem:[%s1785_s1 + $0x18] sm:$0xff]  ;;  %v1313_v6 = vld [vmem:[%s1785_s1 + $0x20] sm:$0xff]  ;;  %v1318_v7 = vld [vmem:[%s1785_s1 + $0x28] sm:$0xff] }
   0x3   :  { %v63_v5 = vpack.c.bf16 %v1306_v4, %v1299_v2  ;;  %v1323_v8 = vld [vmem:[%s1785_s1 + $0x30] sm:$0xff]  ;;  %v64_v9 = vpack.c.bf16 %v1318_v7, %v1313_v6  ;;  %v1330_v10 = vld [vmem:[%s1785_s1 + $0x38] sm:$0xff]  ;;  %v1335_v11 = vld [vmem:[%s1786_s0] sm:$0xff]  }
   0x4   :  { %1041 = vmatprep.subr.bf16.mxu0 %v62_v3  ;;  %1057 = vmatprep.mubr.bf16.mxu0 %v1335_v11  ;;  %v65_v12 = vpack.c.bf16 %v1330_v10, %v1323_v8  ;;  %v1343_v13 = vld [vmem:[%s1785_s1 + $0x40] sm:$0xff]  ;;  %v1348_v14 = vld [vmem:[%s1785_s1 + $0x48] sm:$0xff]  ;;  %v1353_v15 = vld [vmem:[%s1785_s1 + $0x50] sm:$0xff] }
   0x5   :  { %1042 = vmatpush3.bf16.msra.mxu0 %v62_v3  ;;  %v66_v16 = vpack.c.bf16 %v1348_v14, %v1343_v13  ;;  %v1360_v17 = vld [vmem:[%s1785_s1 + $0x58] sm:$0xff]  ;;  %v1225_v18 = vld [vmem:[%s1787_s4] sm:$0xff]   ;;  %v1226_v19 = vld [vmem:[%s1787_s4 + $0x8] sm:$0xff]  }
   0x6   :  { %1043 = vmatprep.subr.bf16.mxu0 %v63_v5  ;;  %v1371_v20 = vld [vmem:[%s1785_s1 + $0x60] sm:$0xff]  ;;  %1073 = vmatprep.subr.bf16.mxu1 %v1225_v18  ;;  %v67_v21 = vpack.c.bf16 %v1360_v17, %v1353_v15  ;;  %v1378_v22 = vld [vmem:[%s1785_s1 + $0x68] sm:$0xff]  ;;  %v1227_v23 = vld [vmem:[%s1787_s4 + $0x10] sm:$0xff]  }
   0x7   :  { %1074 = vmatpush3.bf16.msra.mxu1 %v1225_v18  ;;  %v68_v24 = vpack.c.bf16 %v1378_v22, %v1371_v20  ;;  %v1388_v25 = vld [vmem:[%s1785_s1 + $0x70] sm:$0xff]  ;;  %v1393_v26 = vld [vmem:[%s1785_s1 + $0x78] sm:$0xff]  ;;  %v1229_v29 = vld [vmem:[%s1787_s4 + $0x20] sm:$0xff]  }
   0x8   :  { %1075 = vmatprep.subr.bf16.mxu1 %v1226_v19  ;;  %v1228_v27 = vld [vmem:[%s1787_s4 + $0x18] sm:$0xff]   ;;  %v69_v28 = vpack.c.bf16 %v1393_v26, %v1388_v25  ;;  %v1230_v30 = vld [vmem:[%s1787_s4 + $0x28] sm:$0xff]   ;;  %v1414_v32 = vld [vmem:[%s1786_s0 + $0x10] sm:$0xff]  }
   0x9   :  { %1044 = vmatpush3.bf16.msra.mxu0 %v63_v5  ;;  %v1409_v31 = vld [vmem:[%s1786_s0 + $0x8] sm:$0xff]   ;;  %v1421_v33 = vld [vmem:[%s1786_s0 + $0x18] sm:$0xff]   ;;  %v1426_v34 = vld [vmem:[%s1786_s0 + $0x20] sm:$0xff]  }
   0xa   :  { %1045 = vmatprep.subr.bf16.mxu0 %v64_v9  ;;  %v1433_v35 = vld [vmem:[%s1786_s0 + $0x28] sm:$0xff]   ;;  %v1438_v36 = vld [vmem:[%s1786_s0 + $0x30] sm:$0xff]   ;;  %v1445_v37 = vld [vmem:[%s1786_s0 + $0x38] sm:$0xff]  }
   0xb   :  { %1076 = vmatpush3.bf16.msra.mxu1 %v1226_v19  ;;  %v1231_v38 = vld [vmem:[%s1787_s4 + $0x30] sm:$0xff]   ;;  %v1232_v39 = vld [vmem:[%s1787_s4 + $0x38] sm:$0xff]   ;;  %v939_v40 = vld [vmem:[%s1788_s2] ss:$0 sm:$0xff] }
   0xc   :  { %1077 = vmatprep.subr.bf16.mxu1 %v1227_v23 }
   0xd   :  { %1046 = vmatpush3.bf16.msra.mxu0 %v64_v9 }
   0xe   :  { %1047 = vmatprep.subr.bf16.mxu0 %v65_v12 }
   0xf   :  { %1078 = vmatpush3.bf16.msra.mxu1 %v1227_v23 }
  0x10   :  { %1079 = vmatprep.subr.bf16.mxu1 %v1228_v27 }
  0x11   :  { %1048 = vmatpush3.bf16.msra.mxu0 %v65_v12 }
  0x12   :  { %1049 = vmatprep.subr.bf16.mxu0 %v66_v16 }
  0x13   :  { %1080 = vmatpush3.bf16.msra.mxu1 %v1228_v27 }
  0x14   :  { %1081 = vmatprep.subr.bf16.mxu1 %v1229_v29 }
  0x15   :  { %1050 = vmatpush3.bf16.msra.mxu0 %v66_v16 }
  0x16   :  { %1051 = vmatprep.subr.bf16.mxu0 %v67_v21 }
  0x17   :  { %1082 = vmatpush3.bf16.msra.mxu1 %v1229_v29 }
  0x18   :  { %1083 = vmatprep.subr.bf16.mxu1 %v1230_v30 }
  0x19   :  { %1052 = vmatpush3.bf16.msra.mxu0 %v67_v21 }
  0x1a   :  { %1053 = vmatprep.subr.bf16.mxu0 %v68_v24 }
  0x1b   :  { %1084 = vmatpush3.bf16.msra.mxu1 %v1230_v30 }
  0x1c   :  { %1085 = vmatprep.subr.bf16.mxu1 %v1231_v38 }
  0x1d   :  { %1054 = vmatpush3.bf16.msra.mxu0 %v68_v24 }
  0x1e   :  { %1055 = vmatprep.subr.bf16.mxu0 %v69_v28 }
  0x1f   :  { %1086 = vmatpush3.bf16.msra.mxu1 %v1231_v38 }
  0x20   :  { %1087 = vmatprep.subr.bf16.mxu1 %v1232_v39 }
  0x21   :  { %1056 = vmatpush3.bf16.msra.mxu0 %v69_v28 }
  0x23   :  { %1088 = vmatpush3.bf16.msra.mxu1 %v1232_v39 }
  0x24   :  { %1058 = vmatmul.mubr.bf16.vlgmr.msra.gmra.mrb[0].mxu0 %v1409_v31 }
  0x25   :  { %1061 = vmatprep.mubr.bf16.mxu0 %v1414_v32 }
  0x2c   :  { %1062 = vmatmul.mubr.bf16.gmra.mrb[4].mxu0 %v1421_v33 }
  0x2d   :  { %1065 = vmatprep.mubr.bf16.mxu0 %v1426_v34 }
  0x34   :  { %1066 = vmatmul.mubr.bf16.gmra.mrb[8].mxu0 %v1433_v35 }
  0x35   :  { %1069 = vmatprep.mubr.bf16.mxu0 %v1438_v36 }
  0x3c   :  { %1070 = vmatmul.mubr.bf16.gmra.mrb[12].mxu0 %v1445_v37 }
  0x3d   :  { %1121 = vmatprep.mubr.bf16.mxu0 %v1335_v11 }
  0xf7   :  { %v1059_v41 = vpop.f32.mrb[0].mxu0 }
  0xf8   :  { %v224_v42 = vmul.f32 %v1059_v41, %v939_v40  ;;  %v152_v43 = vpop.f32.mrb[1].mxu0 }
  0xf9   :  { %v222_v44 = vmul.f32 %v939_v40, %v152_v43  ;;  %v1060_v45 = vpop.f32.mrb[2].mxu0 }
  0xfa   :  { %v225_v46 = vmul.f32 %v1060_v45, %v939_v40  ;;  %v155_v47 = vpop.f32.mrb[3].mxu0  ;;  %v240_v49 = vsub.f32 %v1299_v2, %v224_v42 }
  0xfb   :  { %v223_v48 = vmul.f32 %v939_v40, %v155_v47  ;;  %v238_v51 = vsub.f32 %v1289_v0, %v222_v44 }
  0xfc   :  { %v241_v50 = vsub.f32 %v1306_v4, %v225_v46  ;;  %v940_v46 = vld [vmem:[%s1789_s5] ss:$0 sm:$0xff] }
  0xfd   :  { %v239_v52 = vsub.f32 %v1294_v1, %v223_v48 }
  0xfe   :  { %v255_v53 = vpack.c.bf16 %v241_v50, %v240_v49 }
  0xff   :  { %v1063_v54 = vpop.f32.mrb[4].mxu0  ;;  %v254_v55 = vpack.c.bf16 %v239_v52, %v238_v51 }
 0x100   :  { %v228_v56 = vmul.f32 %v1063_v54, %v939_v40  ;;  %v168_v57 = vpop.f32.mrb[5].mxu0 }
 0x101   :  { %v226_v58 = vmul.f32 %v939_v40, %v168_v57  ;;  %v1064_v59 = vpop.f32.mrb[6].mxu0  ;;  %1089 = vmatprep.mubr.bf16.mxu1 %v254_v55 }
 0x102   :  { %v229_v60 = vmul.f32 %v1064_v59, %v939_v40  ;;  %v171_v61 = vpop.f32.mrb[7].mxu0  ;;  %1090 = vmatmul.mubr.bf16.vlgmr.msra.gmra.mrb[0].mxu1 %v255_v53  ;;  %v244_v63 = vsub.f32 %v1323_v8, %v228_v56 }
 0x103   :  { %v227_v62 = vmul.f32 %v939_v40, %v171_v61  ;;  %v242_v0 = vsub.f32 %v1313_v6, %v226_v58 }
 0x104   :  { %v245_v2 = vsub.f32 %v1330_v10, %v229_v60 }
 0x105   :  { %v243_v1 = vsub.f32 %v1318_v7, %v227_v62 }
 0x106   :  { %v257_v3 = vpack.c.bf16 %v245_v2, %v244_v63 }
 0x107   :  { %v1067_v4 = vpop.f32.mrb[8].mxu0  ;;  %v256_v5 = vpack.c.bf16 %v243_v1, %v242_v0 }
 0x108   :  { %v232_v9 = vmul.f32 %v1067_v4, %v939_v40  ;;  %v184_v12 = vpop.f32.mrb[9].mxu0 }
 0x109   :  { %v230_v16 = vmul.f32 %v939_v40, %v184_v12  ;;  %v1068_v18 = vpop.f32.mrb[10].mxu0  ;;  %1093 = vmatprep.mubr.bf16.mxu1 %v256_v5 }
 0x10a   :  { %v233_v19 = vmul.f32 %v1068_v18, %v939_v40  ;;  %v187_v21 = vpop.f32.mrb[11].mxu0  ;;  %1094 = vmatmul.mubr.bf16.gmra.mrb[4].mxu1 %v257_v3  ;;  %v248_v8 = vsub.f32 %v1353_v15, %v232_v9 }
 0x10b   :  { %v231_v23 = vmul.f32 %v939_v40, %v187_v21  ;;  %v246_v6 = vsub.f32 %v1343_v13, %v230_v16 }
 0x10c   :  { %v249_v10 = vsub.f32 %v1360_v17, %v233_v19 }
 0x10d   :  { %v247_v7 = vsub.f32 %v1348_v14, %v231_v23 }
 0x10e   :  { %v259_v24 = vpack.c.bf16 %v249_v10, %v248_v8 }
 0x10f   :  { %v1071_v27 = vpop.f32.mrb[12].mxu0  ;;  %v258_v28 = vpack.c.bf16 %v247_v7, %v246_v6 }
 0x110   :  { %v236_v29 = vmul.f32 %v1071_v27, %v939_v40  ;;  %v200_v30 = vpop.f32.mrb[13].mxu0 }
 0x111   :  { %v234_v38 = vmul.f32 %v939_v40, %v200_v30  ;;  %v1072_v39 = vpop.f32.mrb[14].mxu0  ;;  %1097 = vmatprep.mubr.bf16.mxu1 %v258_v28 }
 0x112   :  { %v237_v41 = vmul.f32 %v1072_v39, %v939_v40  ;;  %v203_v42 = vpop.f32.mrb[15].mxu0  ;;  %1098 = vmatmul.mubr.bf16.gmra.mrb[8].mxu1 %v259_v24  ;;  %v252_v15 = vsub.f32 %v1388_v25, %v236_v29 }
 0x113   :  { %v235_v43 = vmul.f32 %v939_v40, %v203_v42  ;;  %v250_v13 = vsub.f32 %v1371_v20, %v234_v38 }
 0x114   :  { %v253_v17 = vsub.f32 %v1393_v26, %v237_v41 }
 0x115   :  { %v251_v14 = vsub.f32 %v1378_v22, %v235_v43 }
 0x116   :  { %v261_v44 = vpack.c.bf16 %v253_v17, %v252_v15 }
 0x117   :  { %v260_v45 = vpack.c.bf16 %v251_v14, %v250_v13 }
 0x119   :  { %1101 = vmatprep.mubr.bf16.mxu1 %v260_v45 }
 0x11a   :  { %1102 = vmatmul.mubr.bf16.gmra.mrb[12].mxu1 %v261_v44 }
 0x11b   :  { %1153 = vmatprep.mubr.bf16.mxu1 %v1335_v11 }
 0x1d5   :  { %v1091_v47 = vpop.f32.mrb[0].mxu1 }
 0x1d6   :  { %v367_v40 = vpop.f32.mrb[1].mxu1  ;;  %v1482_v49 = vadd.f32 %v1091_v47, %v940_v46  ;;  %v1573_v47 = vld [vmem:[%s1790_s6 + $0x8] sm:$0xff]  }
 0x1d7   :  { %v1478_v48 = vadd.f32 %v940_v46, %v367_v40  ;;  %v1092_v25 = vpop.f32.mrb[2].mxu1  ;;  %v1581_v40 = vld [vmem:[%s1790_s6 + $0x10] sm:$0xff]  }
 0x1d8   :  { %v1480_v26 = vadd.f32 %v1092_v25, %v940_v46  ;;  %v370_v20 = vpop.f32.mrb[3].mxu1  ;;  %v432_v52 = vmax.f32 %v1482_v49, 0.0  ;;  %v1588_v25 = vld [vmem:[%s1790_s6 + $0x18] sm:$0xff]  }
 0x1d9   :  { %v1484_v22 = vadd.f32 %v940_v46, %v370_v20  ;;  %v430_v50 = vmax.f32 %v1478_v48, 0.0  ;;  %v1595_v20 = vld [vmem:[%s1790_s6 + $0x20] sm:$0xff]  }
 0x1da   :  { %v433_v11 = vmax.f32 %v1480_v26, 0.0 }
 0x1db   :  { %v431_v51 = vmax.f32 %v1484_v22, 0.0 }
 0x1dc   :  { %v447_v56 = vpack.c.bf16 %v433_v11, %v432_v52 }
 0x1dd   :  { %v446_v53 = vpack.c.bf16 %v431_v51, %v430_v50  ;;  %v1095_v54 = vpop.f32.mrb[4].mxu1 }
 0x1de   :  { %v383_v55 = vpop.f32.mrb[5].mxu1  ;;  %v1502_v61 = vadd.f32 %v1095_v54, %v940_v46  ;;  %v949_v54 = vld [vmem:[%s1791_s3] ss:$0 sm:$0xff] }
 0x1df   :  { %v1498_v57 = vadd.f32 %v940_v46, %v383_v55  ;;  %v1096_v58 = vpop.f32.mrb[6].mxu1  ;;  %1105 = vmatprep.subr.bf16.mxu0 %v446_v53 }
 0x1e0   :  { %v1500_v59 = vadd.f32 %v1096_v58, %v940_v46  ;;  %v386_v60 = vpop.f32.mrb[7].mxu1  ;;  %1106 = vmatpush3.bf16.msra.mxu0 %v446_v53  ;;  %v436_v1 = vmax.f32 %v1502_v61, 0.0  ;;  %v1602_v53 = vld [vmem:[%s1790_s6 + $0x28] sm:$0xff]  }
 0x1e1   :  { %v1504_v62 = vadd.f32 %v940_v46, %v386_v60  ;;  %1107 = vmatprep.subr.bf16.mxu0 %v447_v56  ;;  %v434_v63 = vmax.f32 %v1498_v57, 0.0 }
 0x1e2   :  { %v437_v2 = vmax.f32 %v1500_v59, 0.0 }
 0x1e3   :  { %v435_v0 = vmax.f32 %v1504_v62, 0.0 }
 0x1e4   :  { %1108 = vmatpush3.bf16.msra.mxu0 %v447_v56  ;;  %v449_v9 = vpack.c.bf16 %v437_v2, %v436_v1 }
 0x1e5   :  { %v448_v3 = vpack.c.bf16 %v435_v0, %v434_v63  ;;  %v1099_v4 = vpop.f32.mrb[8].mxu1 }
 0x1e6   :  { %v399_v5 = vpop.f32.mrb[9].mxu1  ;;  %v1522_v21 = vadd.f32 %v1099_v4, %v940_v46 }
 0x1e7   :  { %v1518_v12 = vadd.f32 %v940_v46, %v399_v5  ;;  %v1100_v16 = vpop.f32.mrb[10].mxu1  ;;  %1109 = vmatprep.subr.bf16.mxu0 %v448_v3 }
 0x1e8   :  { %v1520_v18 = vadd.f32 %v1100_v16, %v940_v46  ;;  %v402_v19 = vpop.f32.mrb[11].mxu1  ;;  %1110 = vmatpush3.bf16.msra.mxu0 %v448_v3  ;;  %v440_v7 = vmax.f32 %v1522_v21, 0.0 }
 0x1e9   :  { %v1524_v23 = vadd.f32 %v940_v46, %v402_v19  ;;  %1111 = vmatprep.subr.bf16.mxu0 %v449_v9  ;;  %v438_v8 = vmax.f32 %v1518_v12, 0.0 }
 0x1ea   :  { %v441_v10 = vmax.f32 %v1520_v18, 0.0 }
 0x1eb   :  { %v439_v6 = vmax.f32 %v1524_v23, 0.0 }
 0x1ec   :  { %1112 = vmatpush3.bf16.msra.mxu0 %v449_v9  ;;  %v451_v29 = vpack.c.bf16 %v441_v10, %v440_v7 }
 0x1ed   :  { %v450_v24 = vpack.c.bf16 %v439_v6, %v438_v8  ;;  %v1103_v27 = vpop.f32.mrb[12].mxu1 }
 0x1ee   :  { %v415_v28 = vpop.f32.mrb[13].mxu1  ;;  %v1542_v42 = vadd.f32 %v1103_v27, %v940_v46 }
 0x1ef   :  { %v1538_v30 = vadd.f32 %v940_v46, %v415_v28  ;;  %v1104_v38 = vpop.f32.mrb[14].mxu1  ;;  %1113 = vmatprep.subr.bf16.mxu0 %v450_v24 }
 0x1f0   :  { %v1540_v39 = vadd.f32 %v1104_v38, %v940_v46  ;;  %v418_v41 = vpop.f32.mrb[15].mxu1  ;;  %1114 = vmatpush3.bf16.msra.mxu0 %v450_v24  ;;  %v444_v14 = vmax.f32 %v1542_v42, 0.0 }
 0x1f1   :  { %v1544_v43 = vadd.f32 %v940_v46, %v418_v41  ;;  %1115 = vmatprep.subr.bf16.mxu0 %v451_v29  ;;  %v442_v15 = vmax.f32 %v1538_v30, 0.0  ;;  %v1568_v46 = vld [vmem:[%s1790_s6] sm:$0xff]  }
 0x1f2   :  { %v445_v17 = vmax.f32 %v1540_v39, 0.0 }
 0x1f3   :  { %v443_v13 = vmax.f32 %v1544_v43, 0.0 }
 0x1f4   :  { %1116 = vmatpush3.bf16.msra.mxu0 %v451_v29  ;;  %v453_v45 = vpack.c.bf16 %v445_v17, %v444_v14 }
 0x1f5   :  { %v452_v44 = vpack.c.bf16 %v443_v13, %v442_v15 }
 0x1f7   :  { %1117 = vmatprep.subr.bf16.mxu0 %v452_v44 }
 0x1f8   :  { %1118 = vmatpush3.bf16.msra.mxu0 %v452_v44 }
 0x1f9   :  { %1119 = vmatprep.subr.bf16.mxu0 %v453_v45 }
 0x1fc   :  { %1120 = vmatpush3.bf16.msra.mxu0 %v453_v45 }
 0x1fd   :  { %1169 = vmatprep.subr.bf16.mxu0 %v1568_v46 }
 0x1ff   :  { %1122 = vmatmul.mubr.bf16.vlgmr.msra.gmra.mrb[16].mxu0 %v1409_v31 }
 0x200   :  { %1125 = vmatprep.mubr.bf16.mxu0 %v1414_v32  ;;  %1170 = vmatpush3.bf16.msra.mxu0 %v1568_v46 }
 0x201   :  { %1171 = vmatprep.subr.bf16.mxu0 %v1573_v47 }
 0x204   :  { %1172 = vmatpush3.bf16.msra.mxu0 %v1573_v47 }
 0x205   :  { %1173 = vmatprep.subr.bf16.mxu0 %v1581_v40 }
 0x207   :  { %1126 = vmatmul.mubr.bf16.gmra.mrb[20].mxu0 %v1421_v33 }
 0x208   :  { %1129 = vmatprep.mubr.bf16.mxu0 %v1426_v34  ;;  %1174 = vmatpush3.bf16.msra.mxu0 %v1581_v40 }
 0x209   :  { %1175 = vmatprep.subr.bf16.mxu0 %v1588_v25 }
 0x20c   :  { %1176 = vmatpush3.bf16.msra.mxu0 %v1588_v25 }
 0x20d   :  { %1177 = vmatprep.subr.bf16.mxu0 %v1595_v20 }
 0x20f   :  { %1130 = vmatmul.mubr.bf16.gmra.mrb[24].mxu0 %v1433_v35 }
 0x210   :  { %1133 = vmatprep.mubr.bf16.mxu0 %v1438_v36  ;;  %1178 = vmatpush3.bf16.msra.mxu0 %v1595_v20 }
 0x211   :  { %1179 = vmatprep.subr.bf16.mxu0 %v1602_v53 }
 0x214   :  { %1180 = vmatpush3.bf16.msra.mxu0 %v1602_v53 }
 0x217   :  { %1134 = vmatmul.mubr.bf16.gmra.mrb[28].mxu0 %v1445_v37 }
 0x2d2   :  { %v1123_v55 = vpop.f32.mrb[16].mxu0 }
 0x2d3   :  { %v488_v56 = vpop.f32.mrb[17].mxu0  ;;  %v560_v5 = vmul.f32 %v1123_v55, %v949_v54 }
 0x2d4   :  { %v558_v58 = vmul.f32 %v949_v54, %v488_v56  ;;  %v1124_v60 = vpop.f32.mrb[18].mxu0 }
 0x2d5   :  { %v561_v3 = vmul.f32 %v1124_v60, %v949_v54  ;;  %v491_v4 = vpop.f32.mrb[19].mxu0  ;;  %v1624_v27 = vsub.f32 %v432_v52, %v560_v5 }
 0x2d6   :  { %v559_v9 = vmul.f32 %v949_v54, %v491_v4  ;;  %v1612_v16 = vsub.f32 %v430_v50, %v558_v58 }
 0x2d7   :  { %v1616_v19 = vsub.f32 %v433_v11, %v561_v3 }
 0x2d8   :  { %v1620_v24 = vsub.f32 %v431_v51, %v559_v9 }
 0x2d9   :  { %v591_v26 = vpack.c.bf16 %v1616_v19, %v1624_v27 }
 0x2da   :  { %v1127_v28 = vpop.f32.mrb[20].mxu0  ;;  %v590_v29 = vpack.c.bf16 %v1620_v24, %v1612_v16 }
 0x2db   :  { %v504_v38 = vpop.f32.mrb[21].mxu0  ;;  %v564_v22 = vmul.f32 %v1127_v28, %v949_v54 }
 0x2dc   :  { %v562_v48 = vmul.f32 %v949_v54, %v504_v38  ;;  %v1128_v50 = vpop.f32.mrb[22].mxu0  ;;  %1137 = vmatprep.subr.bf16.mxu1 %v590_v29 }
 0x2dd   :  { %v565_v11 = vmul.f32 %v1128_v50, %v949_v54  ;;  %v507_v41 = vpop.f32.mrb[23].mxu0  ;;  %1138 = vmatpush3.bf16.msra.mxu1 %v590_v29  ;;  %v1644_v45 = vsub.f32 %v436_v1, %v564_v22 }
 0x2de   :  { %v563_v51 = vmul.f32 %v949_v54, %v507_v41  ;;  %1139 = vmatprep.subr.bf16.mxu1 %v591_v26  ;;  %v1632_v49 = vsub.f32 %v434_v63, %v562_v48 }
 0x2df   :  { %v1636_v52 = vsub.f32 %v437_v2, %v565_v11 }
 0x2e0   :  { %v1640_v44 = vsub.f32 %v435_v0, %v563_v51 }
 0x2e1   :  { %1140 = vmatpush3.bf16.msra.mxu1 %v591_v26  ;;  %v593_v59 = vpack.c.bf16 %v1636_v52, %v1644_v45 }
 0x2e2   :  { %v1131_v55 = vpop.f32.mrb[24].mxu0  ;;  %v592_v56 = vpack.c.bf16 %v1640_v44, %v1632_v49 }
 0x2e3   :  { %v520_v57 = vpop.f32.mrb[25].mxu0  ;;  %v568_v0 = vmul.f32 %v1131_v55, %v949_v54 }
 0x2e4   :  { %v566_v63 = vmul.f32 %v949_v54, %v520_v57  ;;  %v1132_v58 = vpop.f32.mrb[26].mxu0  ;;  %1141 = vmatprep.subr.bf16.mxu1 %v592_v56 }
 0x2e5   :  { %v569_v2 = vmul.f32 %v1132_v58, %v949_v54  ;;  %v523_v62 = vpop.f32.mrb[27].mxu0  ;;  %1142 = vmatpush3.bf16.msra.mxu1 %v592_v56  ;;  %v1664_v4 = vsub.f32 %v440_v7, %v568_v0 }
 0x2e6   :  { %v567_v60 = vmul.f32 %v949_v54, %v523_v62  ;;  %1143 = vmatprep.subr.bf16.mxu1 %v593_v59  ;;  %v1652_v61 = vsub.f32 %v438_v8, %v566_v63 }
 0x2e7   :  { %v1656_v1 = vsub.f32 %v441_v10, %v569_v2 }
 0x2e8   :  { %v1660_v3 = vsub.f32 %v439_v6, %v567_v60 }
 0x2e9   :  { %1144 = vmatpush3.bf16.msra.mxu1 %v593_v59  ;;  %v595_v18 = vpack.c.bf16 %v1656_v1, %v1664_v4 }
 0x2ea   :  { %v1135_v5 = vpop.f32.mrb[28].mxu0  ;;  %v594_v9 = vpack.c.bf16 %v1660_v3, %v1652_v61 }
 0x2eb   :  { %v536_v12 = vpop.f32.mrb[29].mxu0  ;;  %v572_v6 = vmul.f32 %v1135_v5, %v949_v54 }
 0x2ec   :  { %v570_v8 = vmul.f32 %v949_v54, %v536_v12  ;;  %v1136_v28 = vpop.f32.mrb[30].mxu0  ;;  %1145 = vmatprep.subr.bf16.mxu1 %v594_v9 }
 0x2ed   :  { %v573_v10 = vmul.f32 %v1136_v28, %v949_v54  ;;  %v539_v23 = vpop.f32.mrb[31].mxu0  ;;  %1146 = vmatpush3.bf16.msra.mxu1 %v594_v9  ;;  %v1684_v48 = vsub.f32 %v444_v14, %v572_v6 }
 0x2ee   :  { %v571_v29 = vmul.f32 %v949_v54, %v539_v23  ;;  %1147 = vmatprep.subr.bf16.mxu1 %v595_v18  ;;  %v1672_v21 = vsub.f32 %v442_v15, %v570_v8 }
 0x2ef   :  { %v1676_v7 = vsub.f32 %v445_v17, %v573_v10 }
 0x2f0   :  { %v1680_v38 = vsub.f32 %v443_v13, %v571_v29 }
 0x2f1   :  { %1148 = vmatpush3.bf16.msra.mxu1 %v595_v18  ;;  %v597_v30 = vpack.c.bf16 %v1676_v7, %v1684_v48 }
 0x2f2   :  { %v596_v54 = vpack.c.bf16 %v1680_v38, %v1672_v21 }
 0x2f4   :  { %1149 = vmatprep.subr.bf16.mxu1 %v596_v54 }
 0x2f5   :  { %1150 = vmatpush3.bf16.msra.mxu1 %v596_v54 }
 0x2f6   :  { %1151 = vmatprep.subr.bf16.mxu1 %v597_v30 }
 0x2f9   :  { %1152 = vmatpush3.bf16.msra.mxu1 %v597_v30  ;;  %v952_v30 = vld [vmem:[%s1792_s7] ss:$0 sm:$0xff] }
 0x2fa   :  { %1201 = vmatprep.subr.bf16.mxu1 %v1568_v46 }
 0x2fc   :  { %1154 = vmatmul.mubr.bf16.vlgmr.msra.gmra.mrb[16].mxu1 %v1409_v31  ;;  %v1239_v31 = vld [vmem:[%s1790_s6 + $0x30] sm:$0xff]  }
 0x2fd   :  { %1157 = vmatprep.mubr.bf16.mxu1 %v1414_v32  ;;  %1209 = vmatpush3.bf16.msra.mxu1 %v1568_v46  ;;  %v1240_v32 = vld [vmem:[%s1790_s6 + $0x38] sm:$0xff]  }
 0x2fe   :  { %1202 = vmatprep.subr.bf16.mxu1 %v1573_v47  ;;  %1181 = vmatprep.subr.bf16.mxu0 %v1239_v31 }
 0x2ff   :  { %1182 = vmatpush3.bf16.msra.mxu0 %v1239_v31 }
 0x300   :  { %1183 = vmatprep.subr.bf16.mxu0 %v1240_v32 }
 0x301   :  { %1210 = vmatpush3.bf16.msra.mxu1 %v1573_v47 }
 0x302   :  { %1203 = vmatprep.subr.bf16.mxu1 %v1581_v40 }
 0x303   :  { %1184 = vmatpush3.bf16.msra.mxu0 %v1240_v32 }
 0x304   :  { %1158 = vmatmul.mubr.bf16.gmra.mrb[20].mxu1 %v1421_v33  ;;  %v951_v33 = vld [vmem:[%s1791_s3 + $0x1] ss:$0 sm:$0xff] }
 0x305   :  { %1161 = vmatprep.mubr.bf16.mxu1 %v1426_v34  ;;  %1211 = vmatpush3.bf16.msra.mxu1 %v1581_v40 }
 0x306   :  { %1204 = vmatprep.subr.bf16.mxu1 %v1588_v25 }
 0x309   :  { %1212 = vmatpush3.bf16.msra.mxu1 %v1588_v25 }
 0x30a   :  { %1205 = vmatprep.subr.bf16.mxu1 %v1595_v20 }
 0x30c   :  { %1162 = vmatmul.mubr.bf16.gmra.mrb[24].mxu1 %v1433_v35 }
 0x30d   :  { %1165 = vmatprep.mubr.bf16.mxu1 %v1438_v36  ;;  %1213 = vmatpush3.bf16.msra.mxu1 %v1595_v20 }
 0x30e   :  { %1206 = vmatprep.subr.bf16.mxu1 %v1602_v53 }
 0x311   :  { %1214 = vmatpush3.bf16.msra.mxu1 %v1602_v53 }
 0x312   :  { %1207 = vmatprep.subr.bf16.mxu1 %v1239_v31 }
 0x314   :  { %1166 = vmatmul.mubr.bf16.gmra.mrb[28].mxu1 %v1445_v37 }
 0x315   :  { %1215 = vmatpush3.bf16.msra.mxu1 %v1239_v31 }
 0x316   :  { %1208 = vmatprep.subr.bf16.mxu1 %v1240_v32 }
 0x319   :  { %1216 = vmatpush3.bf16.msra.mxu1 %v1240_v32 }
 0x3cf   :  { %v1155_v34 = vpop.f32.mrb[16].mxu1 }
 0x3d0   :  { %v705_v35 = vmul.f32 %v1155_v34, %v951_v33  ;;  %v632_v36 = vpop.f32.mrb[17].mxu1 }
 0x3d1   :  { %v703_v37 = vmul.f32 %v951_v33, %v632_v36  ;;  %v1156_v39 = vpop.f32.mrb[18].mxu1 }
 0x3d2   :  { %v706_v42 = vmul.f32 %v1156_v39, %v951_v33  ;;  %v635_v43 = vpop.f32.mrb[19].mxu1  ;;  %v721_v17 = vsub.f32 %v1624_v27, %v705_v35 }
 0x3d3   :  { %v704_v15 = vmul.f32 %v951_v33, %v635_v43  ;;  %v719_v14 = vsub.f32 %v1612_v16, %v703_v37 }
 0x3d4   :  { %v722_v13 = vsub.f32 %v1616_v19, %v706_v42 }
 0x3d5   :  { %v720_v46 = vsub.f32 %v1620_v24, %v704_v15 }
 0x3d6   :  { %v736_v47 = vpack.c.bf16 %v722_v13, %v721_v17 }
 0x3d7   :  { %v1159_v40 = vpop.f32.mrb[20].mxu1  ;;  %v735_v25 = vpack.c.bf16 %v720_v46, %v719_v14 }
 0x3d8   :  { %v709_v20 = vmul.f32 %v1159_v40, %v951_v33  ;;  %v648_v53 = vpop.f32.mrb[21].mxu1 }
 0x3d9   :  { %v707_v50 = vmul.f32 %v951_v33, %v648_v53  ;;  %v1160_v26 = vpop.f32.mrb[22].mxu1  ;;  %1185 = vmatprep.mubr.bf16.mxu0 %v735_v25 }
 0x3da   :  { %v710_v11 = vmul.f32 %v1160_v26, %v951_v33  ;;  %v651_v41 = vpop.f32.mrb[23].mxu1  ;;  %1186 = vmatmul.mubr.bf16.vlgmr.msra.gmra.mrb[32].mxu0 %v736_v47  ;;  %v725_v27 = vsub.f32 %v1644_v45, %v709_v20 }
 0x3db   :  { %v708_v22 = vmul.f32 %v951_v33, %v651_v41  ;;  %v723_v16 = vsub.f32 %v1632_v49, %v707_v50 }
 0x3dc   :  { %v726_v19 = vsub.f32 %v1636_v52, %v710_v11 }
 0x3dd   :  { %v724_v24 = vsub.f32 %v1640_v44, %v708_v22 }
 0x3de   :  { %v738_v51 = vpack.c.bf16 %v726_v19, %v725_v27 }
 0x3df   :  { %v1163_v55 = vpop.f32.mrb[24].mxu1  ;;  %v737_v56 = vpack.c.bf16 %v724_v24, %v723_v16 }
 0x3e0   :  { %v713_v57 = vmul.f32 %v1163_v55, %v951_v33  ;;  %v664_v63 = vpop.f32.mrb[25].mxu1 }
 0x3e1   :  { %v711_v58 = vmul.f32 %v951_v33, %v664_v63  ;;  %v1164_v59 = vpop.f32.mrb[26].mxu1  ;;  %1189 = vmatprep.mubr.bf16.mxu0 %v737_v56 }
 0x3e2   :  { %v714_v2 = vmul.f32 %v1164_v59, %v951_v33  ;;  %v667_v62 = vpop.f32.mrb[27].mxu1  ;;  %1190 = vmatmul.mubr.bf16.gmra.mrb[36].mxu0 %v738_v51  ;;  %v729_v45 = vsub.f32 %v1664_v4, %v713_v57 }
 0x3e3   :  { %v712_v0 = vmul.f32 %v951_v33, %v667_v62  ;;  %v727_v49 = vsub.f32 %v1652_v61, %v711_v58 }
 0x3e4   :  { %v730_v52 = vsub.f32 %v1656_v1, %v714_v2 }
 0x3e5   :  { %v728_v44 = vsub.f32 %v1660_v3, %v712_v0 }
 0x3e6   :  { %v740_v60 = vpack.c.bf16 %v730_v52, %v729_v45 }
 0x3e7   :  { %v1167_v5 = vpop.f32.mrb[28].mxu1  ;;  %v739_v9 = vpack.c.bf16 %v728_v44, %v727_v49 }
 0x3e8   :  { %v717_v12 = vmul.f32 %v1167_v5, %v951_v33  ;;  %v680_v8 = vpop.f32.mrb[29].mxu1 }
 0x3e9   :  { %v715_v28 = vmul.f32 %v951_v33, %v680_v8  ;;  %v1168_v18 = vpop.f32.mrb[30].mxu1  ;;  %1193 = vmatprep.mubr.bf16.mxu1 %v739_v9 }
 0x3ea   :  { %v718_v10 = vmul.f32 %v1168_v18, %v951_v33  ;;  %v683_v23 = vpop.f32.mrb[31].mxu1  ;;  %1194 = vmatmul.mubr.bf16.vlgmr.msra.gmra.mrb[32].mxu1 %v740_v60  ;;  %v733_v4 = vsub.f32 %v1684_v48, %v717_v12 }
 0x3eb   :  { %v716_v6 = vmul.f32 %v951_v33, %v683_v23  ;;  %v731_v61 = vsub.f32 %v1672_v21, %v715_v28 }
 0x3ec   :  { %v734_v1 = vsub.f32 %v1676_v7, %v718_v10 }
 0x3ed   :  { %v732_v3 = vsub.f32 %v1680_v38, %v716_v6 }
 0x3ee   :  { %v742_v29 = vpack.c.bf16 %v734_v1, %v733_v4 }
 0x3ef   :  { %v741_v54 = vpack.c.bf16 %v732_v3, %v731_v61 }
 0x3f1   :  { %1197 = vmatprep.mubr.bf16.mxu1 %v741_v54 }
 0x3f2   :  { %1198 = vmatmul.mubr.bf16.gmra.mrb[36].mxu1 %v742_v29 }
 0x4ad   :  { %v1187_v31 = vpop.f32.mrb[32].mxu0 }
 0x4ae   :  { %v857_v32 = vadd.f32 %v1187_v31, %v952_v30  ;;  %v848_v34 = vpop.f32.mrb[33].mxu0 }
 0x4af   :  { %v849_v33 = vadd.f32 %v952_v30, %v848_v34  ;;  %v1188_v35 = vpop.f32.mrb[34].mxu0 }
 0x4b0   :  { %913 = vst [vmem:[%s1793_s8 + $0x10] sm:$0xff] %v857_v32  ;;  %v860_v21 = vadd.f32 %v1188_v35, %v952_v30  ;;  %v851_v7 = vpop.f32.mrb[35].mxu0 }
 0x4b1   :  { %911 = vst [vmem:[%s1793_s8] sm:$0xff] %v849_v33  ;;  %v852_v38 = vadd.f32 %v952_v30, %v851_v7 }
 0x4b2   :  { %914 = vst [vmem:[%s1793_s8 + $0x18] sm:$0xff] %v860_v21 }
 0x4b3   :  { %912 = vst [vmem:[%s1793_s8 + $0x8] sm:$0xff] %v852_v38 }
 0x4b5   :  { %v1191_v48 = vpop.f32.mrb[36].mxu0 }
 0x4b6   :  { %v873_v36 = vadd.f32 %v1191_v48, %v952_v30  ;;  %v864_v37 = vpop.f32.mrb[37].mxu0 }
 0x4b7   :  { %v865_v39 = vadd.f32 %v952_v30, %v864_v37  ;;  %v1192_v42 = vpop.f32.mrb[38].mxu0 }
 0x4b8   :  { %917 = vst [vmem:[%s1793_s8 + $0x30] sm:$0xff] %v873_v36  ;;  %v876_v43 = vadd.f32 %v1192_v42, %v952_v30  ;;  %v867_v15 = vpop.f32.mrb[39].mxu0 }
 0x4b9   :  { %915 = vst [vmem:[%s1793_s8 + $0x20] sm:$0xff] %v865_v39  ;;  %v868_v17 = vadd.f32 %v952_v30, %v867_v15 }
 0x4ba   :  { %918 = vst [vmem:[%s1793_s8 + $0x38] sm:$0xff] %v876_v43 }
 0x4bb   :  { %916 = vst [vmem:[%s1793_s8 + $0x28] sm:$0xff] %v868_v17 }
 0x4bd   :  { %v1195_v13 = vpop.f32.mrb[32].mxu1 }
 0x4be   :  { %v889_v14 = vadd.f32 %v1195_v13, %v952_v30  ;;  %v880_v46 = vpop.f32.mrb[33].mxu1 }
 0x4bf   :  { %v881_v47 = vadd.f32 %v952_v30, %v880_v46  ;;  %v1196_v40 = vpop.f32.mrb[34].mxu1 }
 0x4c0   :  { %921 = vst [vmem:[%s1793_s8 + $0x50] sm:$0xff] %v889_v14  ;;  %v892_v25 = vadd.f32 %v1196_v40, %v952_v30  ;;  %v883_v20 = vpop.f32.mrb[35].mxu1 }
 0x4c1   :  { %919 = vst [vmem:[%s1793_s8 + $0x40] sm:$0xff] %v881_v47  ;;  %v884_v53 = vadd.f32 %v952_v30, %v883_v20 }
 0x4c2   :  { %922 = vst [vmem:[%s1793_s8 + $0x58] sm:$0xff] %v892_v25 }
 0x4c3   :  { %920 = vst [vmem:[%s1793_s8 + $0x48] sm:$0xff] %v884_v53 }
 0x4c5   :  { %v1199_v50 = vpop.f32.mrb[36].mxu1 }
 0x4c6   :  { %v905_v26 = vadd.f32 %v1199_v50, %v952_v30  ;;  %v896_v11 = vpop.f32.mrb[37].mxu1 }
 0x4c7   :  { %v897_v41 = vadd.f32 %v952_v30, %v896_v11  ;;  %v1200_v22 = vpop.f32.mrb[38].mxu1 }
 0x4c8   :  { %925 = vst [vmem:[%s1793_s8 + $0x70] sm:$0xff] %v905_v26  ;;  %v908_v27 = vadd.f32 %v1200_v22, %v952_v30  ;;  %v899_v19 = vpop.f32.mrb[39].mxu1 }
 0x4c9   :  { %923 = vst [vmem:[%s1793_s8 + $0x60] sm:$0xff] %v897_v41  ;;  %v900_v16 = vadd.f32 %v952_v30, %v899_v19 }
 0x4ca   :  { %926 = vst [vmem:[%s1793_s8 + $0x78] sm:$0xff] %v908_v27 }
 0x4cb   :  { %924 = vst [vmem:[%s1793_s8 + $0x68] sm:$0xff] %v900_v16 }

</bundles_post_ra>
